<compile_context>
chip_gen: v7x
topology: tpu7x:2x2x1
jax: 0.10.0
libtpu: 0.0.40
codegen_flags: <defaults>
</compile_context>

<pallas_src>
import functools

import numpy as np
import jax
import jax.numpy as jnp
from jax.experimental import pallas as pl
from jax.experimental.pallas import tpu as pltpu

_SUBLANES = 8    # f32 sublanes per vreg -> tracks packed per block row-group
_LANES = 128     # lane width -> frame axis padded to a multiple of this


def _f0_interp_kernel(f0_ref, f0_out_ref, uv_out_ref):
    """norm_f0 -> np.interp over unvoiced frames -> denorm_f0, one track per sublane row.

    f0_ref / f0_out_ref: (rows, n_pad) f32; uv_out_ref: (rows, n_pad) int32 (0/1).
    Invariant: padded lanes / padded rows must be exactly 0 (i.e. unvoiced) so the
    backward scan carries "no next breakpoint" and endpoint clamping matches np.interp.
    """
    f0 = f0_ref[...]
    rows, n_pad = f0.shape

    uv = f0 == 0.0
    voiced = jnp.logical_not(uv)

    # norm_f0: log2(f0 + uv); unvoiced lanes give log2(1)=0 and are overwritten below.
    f0n = jnp.log2(f0 + uv.astype(jnp.float32))

    col = jax.lax.broadcasted_iota(jnp.int32, (rows, n_pad), 1)

    # Forward-scan state: nearest voiced breakpoint at-or-before each lane.
    prev_idx = jnp.where(voiced, col, -1)
    prev_val = jnp.where(voiced, f0n, 0.0)
    # Backward-scan state: nearest voiced breakpoint at-or-after each lane.
    next_idx = jnp.where(voiced, col, n_pad)
    next_val = jnp.where(voiced, f0n, 0.0)

    # Hillis-Steele scans: ~2*log2(n_pad) cheap XLU lane rotations + VPU selects.
    # Rolls along axis=1 rotate each sublane row independently, so every packed track
    # is scanned in parallel for free.
    # TODO(synk): for a single very long track (n_pad >~ 2048) the ~7 full-width live
    # arrays exceed the 64-vreg file; fold the row to (8, n_pad/8) with a 3-step
    # cross-sublane combine (or chunk over a sequential grid axis with an SMEM carry)
    # to bound vreg pressure.  Not needed at typical track lengths / batched use.
    n_steps = max(1, int(np.ceil(np.log2(n_pad))))
    shift = 1
    for _ in range(n_steps):
        # prev: pull from lane i-shift (wrap-around lanes masked to identity).
        r_idx = pltpu.roll(prev_idx, shift, axis=1)
        r_val = pltpu.roll(prev_val, shift, axis=1)
        take = (col >= shift) & (r_idx > prev_idx)
        prev_idx = jnp.where(take, r_idx, prev_idx)
        prev_val = jnp.where(take, r_val, prev_val)
        # next: pull from lane i+shift (roll by n_pad-shift; wrap lanes masked).
        r_idx = pltpu.roll(next_idx, n_pad - shift, axis=1)
        r_val = pltpu.roll(next_val, n_pad - shift, axis=1)
        take = (col < n_pad - shift) & (r_idx < next_idx)
        next_idx = jnp.where(take, r_idx, next_idx)
        next_val = jnp.where(take, r_val, next_val)
        shift *= 2

    has_prev = prev_idx >= 0
    has_next = next_idx < n_pad

    denom = jnp.maximum(next_idx - prev_idx, 1).astype(jnp.float32)
    # EUP approximate reciprocal: the f32 divide leaves the VPU and rides the free EUP slot.
    t = (col - prev_idx).astype(jnp.float32) * pl.reciprocal(denom, approx=True)
    interp = prev_val + (next_val - prev_val) * t

    neg_inf = jnp.float32(-jnp.inf)
    # np.interp endpoint clamping; if a row has no voiced frame at all, keep -inf
    # (matches interp_f0 skipping interpolation when uv.all()).
    interp = jnp.where(
        has_prev & has_next, interp,
        jnp.where(has_next, next_val, jnp.where(has_prev, prev_val, neg_inf)))

    f0n_final = jnp.where(uv, interp, f0n)

    # denorm_f0 with uv=None: f0 = 2 ** f0  (exp2(-inf) = 0)
    f0_out_ref[...] = jnp.exp2(f0n_final)
    uv_out_ref[...] = uv.astype(jnp.int32)


def _pallas_interp_rows(f0_rows):
    """f0_rows: (b_pad, n_pad) f32, b_pad % 8 == 0, n_pad % 128 == 0, zero-padded."""
    b_pad, n_pad = f0_rows.shape
    out_shape = (jax.ShapeDtypeStruct((b_pad, n_pad), jnp.float32),
                 jax.ShapeDtypeStruct((b_pad, n_pad), jnp.int32))
    n_groups = b_pad // _SUBLANES

    if n_groups == 1:
        # Single row-group: whole-array VMEM blocks, no grid (drops the one-step
        # pipelining prologue/epilogue).
        return pl.pallas_call(
            _f0_interp_kernel,
            out_shape=out_shape,
            in_specs=[pl.BlockSpec(memory_space=pltpu.MemorySpace.VMEM)],
            out_specs=(pl.BlockSpec(memory_space=pltpu.MemorySpace.VMEM),
                       pl.BlockSpec(memory_space=pltpu.MemorySpace.VMEM)),
        )(f0_rows)

    # Multiple row-groups: grid over groups of 8 tracks, marked "parallel" so Mosaic
    # can shard them across TensorCores on v7x (no-op on v5e/v6e).
    return pl.pallas_call(
        _f0_interp_kernel,
        out_shape=out_shape,
        grid=(n_groups,),
        in_specs=[pl.BlockSpec((_SUBLANES, n_pad), lambda g: (g, 0))],
        out_specs=(pl.BlockSpec((_SUBLANES, n_pad), lambda g: (g, 0)),
                   pl.BlockSpec((_SUBLANES, n_pad), lambda g: (g, 0))),
        compiler_params=pltpu.CompilerParams(
            dimension_semantics=("parallel",)),
    )(f0_rows)


def _interp_core(f0):
    """interp_f0 equivalent. f0: (n,) or (B, n) f32, zeros = unvoiced.
    Returns (f0_interp, uv) with the same leading shape."""
    squeeze = f0.ndim == 1
    f0_2d = f0.reshape(1, -1) if squeeze else f0
    f0_2d = f0_2d.astype(jnp.float32)
    b, n = f0_2d.shape
    b_pad = ((b + _SUBLANES - 1) // _SUBLANES) * _SUBLANES
    n_pad = max(_LANES, ((n + _LANES - 1) // _LANES) * _LANES)
    # Zero padding is load-bearing: padded frames must read as unvoiced (see kernel).
    f0_rows = jnp.pad(f0_2d, ((0, b_pad - b), (0, n_pad - n)))

    f0_out, uv_out = _pallas_interp_rows(f0_rows)
    f0_out = f0_out[:b, :n]
    uv_out = uv_out[:b, :n].astype(jnp.bool_)
    if squeeze:
        return f0_out[0], uv_out[0]
    return f0_out, uv_out


# Public single-dispatch entry point (pad + kernel + slice + bool cast fused under one jit).
interp_f0_jax = jax.jit(_interp_core)


@functools.partial(jax.jit, static_argnums=(1, 2))
def _analyze(f0_raw, n_frames, interp_uv):
    f0_raw = f0_raw.astype(jnp.float32)
    n = f0_raw.shape[-1]
    if n >= n_frames:
        f0_raw = f0_raw[..., :n_frames]
    else:
        pad_width = [(0, 0)] * (f0_raw.ndim - 1) + [(0, n_frames - n)]
        f0_raw = jnp.pad(f0_raw, pad_width)
    if interp_uv:
        return _interp_core(f0_raw)
    return f0_raw, f0_raw == 0.0


class F0AnalyzerPallas:
    """JAX/Pallas port of F0Analyzer (no learnable parameters in the module)."""

    def __init__(self, sampling_rate: int, f0_extractor: str, hop_size: int,
                 f0_min: float, f0_max: float):
        self.sampling_rate = sampling_rate
        self.f0_extractor = f0_extractor
        self.hop_size = hop_size
        self.f0_min = f0_min
        self.f0_max = f0_max

    def __call__(self, f0_raw, n_frames: int, interp_uv: bool = True):
        # TODO(synk): pyworld.harvest / parselmouth F0 extraction from the raw waveform
        # is an external iterative C DSP library with no Pallas equivalent; this class
        # consumes the frame-level f0 track (zeros = unvoiced) it produces.
        return _analyze(jnp.asarray(f0_raw, dtype=jnp.float32), int(n_frames),
                        bool(interp_uv))


# ---------------- numpy reference (verbatim semantics of the PyTorch module) ----------------
def _denorm_f0_np(f0, uv, pitch_padding=None):
    f0 = 2 ** f0
    if uv is not None:
        f0[uv > 0] = 0
    if pitch_padding is not None:
        f0[pitch_padding] = 0
    return f0


def _norm_f0_np(f0, uv=None):
    if uv is None:
        uv = f0 == 0
    f0 = np.log2(f0 + uv)
    f0[uv] = -np.inf
    return f0


def _interp_f0_np(f0, uv=None):
    if uv is None:
        uv = f0 == 0
    f0 = _norm_f0_np(f0, uv)
    if uv.any() and (not uv.all()):
        f0[uv] = np.interp(np.where(uv)[0], np.where(~uv)[0], f0[~uv])
    return _denorm_f0_np(f0, uv=None), uv


if __name__ == "__main__":
    key = jax.random.PRNGKey(0)
    analyzer = F0AnalyzerPallas(sampling_rate=44100, f0_extractor="harvest",
                                hop_size=512, f0_min=65.0, f0_max=800.0)

    # ---- single track (exercises the no-grid, whole-array VMEM path) ----
    n_frames = 100
    k1, k2, k3 = jax.random.split(key, 3)
    voiced_f0 = jax.random.uniform(k1, (n_frames,), minval=65.0, maxval=800.0)
    uv_mask = jax.random.uniform(k2, (n_frames,)) < 0.3
    uv_mask = uv_mask.at[0].set(True).at[n_frames - 1].set(True)
    f0_raw = jnp.where(uv_mask, 0.0, voiced_f0).astype(jnp.float32)

    f0_out, uv_out = analyzer(f0_raw, n_frames, interp_uv=True)
    f0_out = jax.block_until_ready(f0_out)
    uv_out = jax.block_until_ready(uv_out)

    f0_ref, uv_ref = _interp_f0_np(np.asarray(f0_raw, dtype=np.float32).copy())
    assert np.array_equal(np.asarray(uv_out), uv_ref), "uv mask mismatch (single)"
    # f32 lerp + EUP approximate reciprocal vs float64 np.interp -> sub-percent parity.
    np.testing.assert_allclose(np.asarray(f0_out), f0_ref, rtol=1e-2, atol=1e-2)

    # ---- batched tracks (exercises sublane packing + "parallel" grid over row groups) ----
    B, n_b = 10, 300
    kb1, kb2 = jax.random.split(k3)
    v_b = jax.random.uniform(kb1, (B, n_b), minval=65.0, maxval=800.0)
    uv_b = jax.random.uniform(kb2, (B, n_b)) < 0.3
    uv_b = uv_b.at[:, 0].set(True).at[:, -1].set(True)
    uv_b = uv_b.at[0].set(False)   # all-voiced row (reference skips interpolation)
    uv_b = uv_b.at[1].set(True)    # all-unvoiced row (reference skips interpolation)
    f0_batch = jnp.where(uv_b, 0.0, v_b).astype(jnp.float32)

    f0_out_b, uv_out_b = analyzer(f0_batch, n_b, interp_uv=True)
    f0_out_b = jax.block_until_ready(f0_out_b)
    uv_out_b = jax.block_until_ready(uv_out_b)

    refs = [_interp_f0_np(np.asarray(f0_batch[r], dtype=np.float32).copy())
            for r in range(B)]
    f0_ref_b = np.stack([r[0] for r in refs])
    uv_ref_b = np.stack([r[1] for r in refs])
    assert np.array_equal(np.asarray(uv_out_b), uv_ref_b), "uv mask mismatch (batched)"
    np.testing.assert_allclose(np.asarray(f0_out_b), f0_ref_b, rtol=1e-2, atol=1e-2)

    print("KERNEL_OK")
</pallas_src>

<mosaic_0001>
module attributes {stable_mosaic.version = 11 : i64} {
  func.func @_f0_interp_kernel(%arg0: memref<8x128xf32, #tpu.memory_space<vmem>>, %arg1: memref<8x128xf32, #tpu.memory_space<vmem>>, %arg2: memref<8x128xi32, #tpu.memory_space<vmem>>) attributes {dimension_semantics = [], scalar_prefetch = 0 : i64, scratch_operands = 0 : i64, tpu.core_type = #tpu.core_type<tc>} {
    %c0 = arith.constant 0 : index
    %c0_0 = arith.constant 0 : index
    %0 = vector.load %arg0[%c0, %c0_0] : memref<8x128xf32, #tpu.memory_space<vmem>>, vector<8x128xf32>
    %cst = arith.constant 0.000000e+00 : f32
    %1 = vector.broadcast %cst : f32 to vector<8x128xf32>
    %2 = arith.cmpf oeq, %0, %1 : vector<8x128xf32>
    %cst_1 = arith.constant dense<true> : vector<8x128xi1>
    %3 = arith.xori %2, %cst_1 : vector<8x128xi1>
    %4 = arith.extui %2 : vector<8x128xi1> to vector<8x128xi32>
    %5 = arith.sitofp %4 : vector<8x128xi32> to vector<8x128xf32>
    %6 = arith.addf %0, %5 : vector<8x128xf32>
    %7 = math.log %6 : vector<8x128xf32>
    %cst_2 = arith.constant 2.000000e+00 : f32
    %8 = math.log %cst_2 : f32
    %9 = vector.broadcast %8 : f32 to vector<8x128xf32>
    %10 = arith.divf %7, %9 : vector<8x128xf32>
    %11 = tpu.iota {dimensions = array<i32: 1>} : vector<8x128xi32>
    %c-1_i32 = arith.constant -1 : i32
    %12 = vector.broadcast %c-1_i32 : i32 to vector<8x128xi32>
    %13 = arith.select %3, %11, %12 : vector<8x128xi1>, vector<8x128xi32>
    %cst_3 = arith.constant 0.000000e+00 : f32
    %14 = vector.broadcast %cst_3 : f32 to vector<8x128xf32>
    %15 = arith.select %3, %10, %14 : vector<8x128xi1>, vector<8x128xf32>
    %c128_i32 = arith.constant 128 : i32
    %16 = vector.broadcast %c128_i32 : i32 to vector<8x128xi32>
    %17 = arith.select %3, %11, %16 : vector<8x128xi1>, vector<8x128xi32>
    %cst_4 = arith.constant 0.000000e+00 : f32
    %18 = vector.broadcast %cst_4 : f32 to vector<8x128xf32>
    %19 = arith.select %3, %10, %18 : vector<8x128xi1>, vector<8x128xf32>
    %c1_i32 = arith.constant 1 : i32
    %20 = tpu.dynamic_rotate %13 by %c1_i32 dim 1 : vector<8x128xi32>, i32 -> vector<8x128xi32>
    %c1_i32_5 = arith.constant 1 : i32
    %21 = tpu.dynamic_rotate %15 by %c1_i32_5 dim 1 : vector<8x128xf32>, i32 -> vector<8x128xf32>
    %c1_i32_6 = arith.constant 1 : i32
    %22 = vector.broadcast %c1_i32_6 : i32 to vector<8x128xi32>
    %23 = arith.cmpi sge, %11, %22 : vector<8x128xi32>
    %24 = arith.cmpi sgt, %20, %13 : vector<8x128xi32>
    %25 = arith.andi %23, %24 : vector<8x128xi1>
    %26 = arith.select %25, %20, %13 : vector<8x128xi1>, vector<8x128xi32>
    %27 = arith.select %25, %21, %15 : vector<8x128xi1>, vector<8x128xf32>
    %c127_i32 = arith.constant 127 : i32
    %28 = tpu.dynamic_rotate %17 by %c127_i32 dim 1 : vector<8x128xi32>, i32 -> vector<8x128xi32>
    %c127_i32_7 = arith.constant 127 : i32
    %29 = tpu.dynamic_rotate %19 by %c127_i32_7 dim 1 : vector<8x128xf32>, i32 -> vector<8x128xf32>
    %c127_i32_8 = arith.constant 127 : i32
    %30 = vector.broadcast %c127_i32_8 : i32 to vector<8x128xi32>
    %31 = arith.cmpi slt, %11, %30 : vector<8x128xi32>
    %32 = arith.cmpi slt, %28, %17 : vector<8x128xi32>
    %33 = arith.andi %31, %32 : vector<8x128xi1>
    %34 = arith.select %33, %28, %17 : vector<8x128xi1>, vector<8x128xi32>
    %35 = arith.select %33, %29, %19 : vector<8x128xi1>, vector<8x128xf32>
    %c2_i32 = arith.constant 2 : i32
    %36 = tpu.dynamic_rotate %26 by %c2_i32 dim 1 : vector<8x128xi32>, i32 -> vector<8x128xi32>
    %c2_i32_9 = arith.constant 2 : i32
    %37 = tpu.dynamic_rotate %27 by %c2_i32_9 dim 1 : vector<8x128xf32>, i32 -> vector<8x128xf32>
    %c2_i32_10 = arith.constant 2 : i32
    %38 = vector.broadcast %c2_i32_10 : i32 to vector<8x128xi32>
    %39 = arith.cmpi sge, %11, %38 : vector<8x128xi32>
    %40 = arith.cmpi sgt, %36, %26 : vector<8x128xi32>
    %41 = arith.andi %39, %40 : vector<8x128xi1>
    %42 = arith.select %41, %36, %26 : vector<8x128xi1>, vector<8x128xi32>
    %43 = arith.select %41, %37, %27 : vector<8x128xi1>, vector<8x128xf32>
    %c126_i32 = arith.constant 126 : i32
    %44 = tpu.dynamic_rotate %34 by %c126_i32 dim 1 : vector<8x128xi32>, i32 -> vector<8x128xi32>
    %c126_i32_11 = arith.constant 126 : i32
    %45 = tpu.dynamic_rotate %35 by %c126_i32_11 dim 1 : vector<8x128xf32>, i32 -> vector<8x128xf32>
    %c126_i32_12 = arith.constant 126 : i32
    %46 = vector.broadcast %c126_i32_12 : i32 to vector<8x128xi32>
    %47 = arith.cmpi slt, %11, %46 : vector<8x128xi32>
    %48 = arith.cmpi slt, %44, %34 : vector<8x128xi32>
    %49 = arith.andi %47, %48 : vector<8x128xi1>
    %50 = arith.select %49, %44, %34 : vector<8x128xi1>, vector<8x128xi32>
    %51 = arith.select %49, %45, %35 : vector<8x128xi1>, vector<8x128xf32>
    %c4_i32 = arith.constant 4 : i32
    %52 = tpu.dynamic_rotate %42 by %c4_i32 dim 1 : vector<8x128xi32>, i32 -> vector<8x128xi32>
    %c4_i32_13 = arith.constant 4 : i32
    %53 = tpu.dynamic_rotate %43 by %c4_i32_13 dim 1 : vector<8x128xf32>, i32 -> vector<8x128xf32>
    %c4_i32_14 = arith.constant 4 : i32
    %54 = vector.broadcast %c4_i32_14 : i32 to vector<8x128xi32>
    %55 = arith.cmpi sge, %11, %54 : vector<8x128xi32>
    %56 = arith.cmpi sgt, %52, %42 : vector<8x128xi32>
    %57 = arith.andi %55, %56 : vector<8x128xi1>
    %58 = arith.select %57, %52, %42 : vector<8x128xi1>, vector<8x128xi32>
    %59 = arith.select %57, %53, %43 : vector<8x128xi1>, vector<8x128xf32>
    %c124_i32 = arith.constant 124 : i32
    %60 = tpu.dynamic_rotate %50 by %c124_i32 dim 1 : vector<8x128xi32>, i32 -> vector<8x128xi32>
    %c124_i32_15 = arith.constant 124 : i32
    %61 = tpu.dynamic_rotate %51 by %c124_i32_15 dim 1 : vector<8x128xf32>, i32 -> vector<8x128xf32>
    %c124_i32_16 = arith.constant 124 : i32
    %62 = vector.broadcast %c124_i32_16 : i32 to vector<8x128xi32>
    %63 = arith.cmpi slt, %11, %62 : vector<8x128xi32>
    %64 = arith.cmpi slt, %60, %50 : vector<8x128xi32>
    %65 = arith.andi %63, %64 : vector<8x128xi1>
    %66 = arith.select %65, %60, %50 : vector<8x128xi1>, vector<8x128xi32>
    %67 = arith.select %65, %61, %51 : vector<8x128xi1>, vector<8x128xf32>
    %c8_i32 = arith.constant 8 : i32
    %68 = tpu.dynamic_rotate %58 by %c8_i32 dim 1 : vector<8x128xi32>, i32 -> vector<8x128xi32>
    %c8_i32_17 = arith.constant 8 : i32
    %69 = tpu.dynamic_rotate %59 by %c8_i32_17 dim 1 : vector<8x128xf32>, i32 -> vector<8x128xf32>
    %c8_i32_18 = arith.constant 8 : i32
    %70 = vector.broadcast %c8_i32_18 : i32 to vector<8x128xi32>
    %71 = arith.cmpi sge, %11, %70 : vector<8x128xi32>
    %72 = arith.cmpi sgt, %68, %58 : vector<8x128xi32>
    %73 = arith.andi %71, %72 : vector<8x128xi1>
    %74 = arith.select %73, %68, %58 : vector<8x128xi1>, vector<8x128xi32>
    %75 = arith.select %73, %69, %59 : vector<8x128xi1>, vector<8x128xf32>
    %c120_i32 = arith.constant 120 : i32
    %76 = tpu.dynamic_rotate %66 by %c120_i32 dim 1 : vector<8x128xi32>, i32 -> vector<8x128xi32>
    %c120_i32_19 = arith.constant 120 : i32
    %77 = tpu.dynamic_rotate %67 by %c120_i32_19 dim 1 : vector<8x128xf32>, i32 -> vector<8x128xf32>
    %c120_i32_20 = arith.constant 120 : i32
    %78 = vector.broadcast %c120_i32_20 : i32 to vector<8x128xi32>
    %79 = arith.cmpi slt, %11, %78 : vector<8x128xi32>
    %80 = arith.cmpi slt, %76, %66 : vector<8x128xi32>
    %81 = arith.andi %79, %80 : vector<8x128xi1>
    %82 = arith.select %81, %76, %66 : vector<8x128xi1>, vector<8x128xi32>
    %83 = arith.select %81, %77, %67 : vector<8x128xi1>, vector<8x128xf32>
    %c16_i32 = arith.constant 16 : i32
    %84 = tpu.dynamic_rotate %74 by %c16_i32 dim 1 : vector<8x128xi32>, i32 -> vector<8x128xi32>
    %c16_i32_21 = arith.constant 16 : i32
    %85 = tpu.dynamic_rotate %75 by %c16_i32_21 dim 1 : vector<8x128xf32>, i32 -> vector<8x128xf32>
    %c16_i32_22 = arith.constant 16 : i32
    %86 = vector.broadcast %c16_i32_22 : i32 to vector<8x128xi32>
    %87 = arith.cmpi sge, %11, %86 : vector<8x128xi32>
    %88 = arith.cmpi sgt, %84, %74 : vector<8x128xi32>
    %89 = arith.andi %87, %88 : vector<8x128xi1>
    %90 = arith.select %89, %84, %74 : vector<8x128xi1>, vector<8x128xi32>
    %91 = arith.select %89, %85, %75 : vector<8x128xi1>, vector<8x128xf32>
    %c112_i32 = arith.constant 112 : i32
    %92 = tpu.dynamic_rotate %82 by %c112_i32 dim 1 : vector<8x128xi32>, i32 -> vector<8x128xi32>
    %c112_i32_23 = arith.constant 112 : i32
    %93 = tpu.dynamic_rotate %83 by %c112_i32_23 dim 1 : vector<8x128xf32>, i32 -> vector<8x128xf32>
    %c112_i32_24 = arith.constant 112 : i32
    %94 = vector.broadcast %c112_i32_24 : i32 to vector<8x128xi32>
    %95 = arith.cmpi slt, %11, %94 : vector<8x128xi32>
    %96 = arith.cmpi slt, %92, %82 : vector<8x128xi32>
    %97 = arith.andi %95, %96 : vector<8x128xi1>
    %98 = arith.select %97, %92, %82 : vector<8x128xi1>, vector<8x128xi32>
    %99 = arith.select %97, %93, %83 : vector<8x128xi1>, vector<8x128xf32>
    %c32_i32 = arith.constant 32 : i32
    %100 = tpu.dynamic_rotate %90 by %c32_i32 dim 1 : vector<8x128xi32>, i32 -> vector<8x128xi32>
    %c32_i32_25 = arith.constant 32 : i32
    %101 = tpu.dynamic_rotate %91 by %c32_i32_25 dim 1 : vector<8x128xf32>, i32 -> vector<8x128xf32>
    %c32_i32_26 = arith.constant 32 : i32
    %102 = vector.broadcast %c32_i32_26 : i32 to vector<8x128xi32>
    %103 = arith.cmpi sge, %11, %102 : vector<8x128xi32>
    %104 = arith.cmpi sgt, %100, %90 : vector<8x128xi32>
    %105 = arith.andi %103, %104 : vector<8x128xi1>
    %106 = arith.select %105, %100, %90 : vector<8x128xi1>, vector<8x128xi32>
    %107 = arith.select %105, %101, %91 : vector<8x128xi1>, vector<8x128xf32>
    %c96_i32 = arith.constant 96 : i32
    %108 = tpu.dynamic_rotate %98 by %c96_i32 dim 1 : vector<8x128xi32>, i32 -> vector<8x128xi32>
    %c96_i32_27 = arith.constant 96 : i32
    %109 = tpu.dynamic_rotate %99 by %c96_i32_27 dim 1 : vector<8x128xf32>, i32 -> vector<8x128xf32>
    %c96_i32_28 = arith.constant 96 : i32
    %110 = vector.broadcast %c96_i32_28 : i32 to vector<8x128xi32>
    %111 = arith.cmpi slt, %11, %110 : vector<8x128xi32>
    %112 = arith.cmpi slt, %108, %98 : vector<8x128xi32>
    %113 = arith.andi %111, %112 : vector<8x128xi1>
    %114 = arith.select %113, %108, %98 : vector<8x128xi1>, vector<8x128xi32>
    %115 = arith.select %113, %109, %99 : vector<8x128xi1>, vector<8x128xf32>
    %c64_i32 = arith.constant 64 : i32
    %116 = tpu.dynamic_rotate %106 by %c64_i32 dim 1 : vector<8x128xi32>, i32 -> vector<8x128xi32>
    %c64_i32_29 = arith.constant 64 : i32
    %117 = tpu.dynamic_rotate %107 by %c64_i32_29 dim 1 : vector<8x128xf32>, i32 -> vector<8x128xf32>
    %c64_i32_30 = arith.constant 64 : i32
    %118 = vector.broadcast %c64_i32_30 : i32 to vector<8x128xi32>
    %119 = arith.cmpi sge, %11, %118 : vector<8x128xi32>
    %120 = arith.cmpi sgt, %116, %106 : vector<8x128xi32>
    %121 = arith.andi %119, %120 : vector<8x128xi1>
    %122 = arith.select %121, %116, %106 : vector<8x128xi1>, vector<8x128xi32>
    %123 = arith.select %121, %117, %107 : vector<8x128xi1>, vector<8x128xf32>
    %c64_i32_31 = arith.constant 64 : i32
    %124 = tpu.dynamic_rotate %114 by %c64_i32_31 dim 1 : vector<8x128xi32>, i32 -> vector<8x128xi32>
    %c64_i32_32 = arith.constant 64 : i32
    %125 = tpu.dynamic_rotate %115 by %c64_i32_32 dim 1 : vector<8x128xf32>, i32 -> vector<8x128xf32>
    %c64_i32_33 = arith.constant 64 : i32
    %126 = vector.broadcast %c64_i32_33 : i32 to vector<8x128xi32>
    %127 = arith.cmpi slt, %11, %126 : vector<8x128xi32>
    %128 = arith.cmpi slt, %124, %114 : vector<8x128xi32>
    %129 = arith.andi %127, %128 : vector<8x128xi1>
    %130 = arith.select %129, %124, %114 : vector<8x128xi1>, vector<8x128xi32>
    %131 = arith.select %129, %125, %115 : vector<8x128xi1>, vector<8x128xf32>
    %c0_i32 = arith.constant 0 : i32
    %132 = vector.broadcast %c0_i32 : i32 to vector<8x128xi32>
    %133 = arith.cmpi sge, %122, %132 : vector<8x128xi32>
    %c128_i32_34 = arith.constant 128 : i32
    %134 = vector.broadcast %c128_i32_34 : i32 to vector<8x128xi32>
    %135 = arith.cmpi slt, %130, %134 : vector<8x128xi32>
    %136 = arith.subi %130, %122 : vector<8x128xi32>
    %c1_i32_35 = arith.constant 1 : i32
    %137 = vector.broadcast %c1_i32_35 : i32 to vector<8x128xi32>
    %138 = arith.maxsi %136, %137 : vector<8x128xi32>
    %139 = arith.sitofp %138 : vector<8x128xi32> to vector<8x128xf32>
    %140 = arith.subi %11, %122 : vector<8x128xi32>
    %141 = arith.sitofp %140 : vector<8x128xi32> to vector<8x128xf32>
    %142 = tpu.reciprocal %139 {approx = true} : vector<8x128xf32> -> vector<8x128xf32>
    %143 = arith.mulf %141, %142 : vector<8x128xf32>
    %144 = arith.subf %131, %123 : vector<8x128xf32>
    %145 = arith.mulf %144, %143 : vector<8x128xf32>
    %146 = arith.addf %123, %145 : vector<8x128xf32>
    %147 = arith.andi %133, %135 : vector<8x128xi1>
    %cst_36 = arith.constant 0xFF800000 : f32
    %148 = vector.broadcast %cst_36 : f32 to vector<8x128xf32>
    %149 = arith.select %133, %123, %148 : vector<8x128xi1>, vector<8x128xf32>
    %150 = arith.select %135, %131, %149 : vector<8x128xi1>, vector<8x128xf32>
    %151 = arith.select %147, %146, %150 : vector<8x128xi1>, vector<8x128xf32>
    %152 = arith.select %2, %151, %10 : vector<8x128xi1>, vector<8x128xf32>
    %153 = math.exp2 %152 : vector<8x128xf32>
    %c0_37 = arith.constant 0 : index
    %c0_38 = arith.constant 0 : index
    %154 = vector.load %arg1[%c0_37, %c0_38] : memref<8x128xf32, #tpu.memory_space<vmem>>, vector<8x128xf32>
    tpu.vector_store %arg1[%c0_37, %c0_38], %153 {strides = array<i32>} : memref<8x128xf32, #tpu.memory_space<vmem>>, vector<8x128xf32>,
    %155 = arith.extui %2 : vector<8x128xi1> to vector<8x128xi32>
    %c0_39 = arith.constant 0 : index
    %c0_40 = arith.constant 0 : index
    %156 = vector.load %arg2[%c0_39, %c0_40] : memref<8x128xi32, #tpu.memory_space<vmem>>, vector<8x128xi32>
    tpu.vector_store %arg2[%c0_39, %c0_40], %155 {strides = array<i32>} : memref<8x128xi32, #tpu.memory_space<vmem>>, vector<8x128xi32>,
    return
  }
}

</mosaic_0001>

<bundles_post_ra>
// kernel: _analyze.1
= control target key start
LH: loop header
LB: loop body
LE: loop exit
PB: predicated region body
PF: predicated region fallthrough
CT: control target
= control target key end

     0   :  { %v20_v0 = vlaneseq  ;;  %vm203_vm1 = vmmov 1   ;;  %v204_v4 = vmov 0   ;;  %v205_v6 = vmov 0.0   ;;  %s206_s12 = smov 1   ;;  %s207_s13 = smov 127   ;;  %s296_s0 = inlined_call_operand.vmem [shape: f32[8,128], index: 0, kind: input, shape index: {}]   ;;  %s297_s2 = inlined_call_operand.vmem [shape: s32[8,128], index: 2, kind: output, shape index: {1}]   ;;  %s298_s1 = inlined_call_operand.vmem [shape: f32[8,128], index: 1, kind: output, shape index: {0}]  }
   0x1   :  { %v237_v1 = vld [vmem:[%s296_s0] sm:$0xff]  ;;  %s209_s14 = smov 126   ;;  %s210_s15 = smov 4  }
   0x2   :  { %vm11_vm0 = vcmp.eq.f32.partialorder %v237_v1, 0.0  ;;  %v240_v2 = vand.u32 127, %v20_v0  ;;  %s211_s16 = smov 124   ;;  %s212_s17 = smov 8  }
   0x3   :  { %vm244_vm2 = vmxor %vm11_vm0, %vm203_vm1  ;;  %v13_v5 = vsel %vm11_vm0, 1, %v204_v4  ;;  %v180_v7 = vsel %vm11_vm0, 1.0, %v205_v6  ;;  %s213_s18 = smov 120   ;;  %s214_s19 = smov 16  }
   0x4   :  { %v22_v8 = vsel %vm244_vm2, %v240_v2, 4294967295  ;;  %171 = vst [vmem:[%s297_s2] sm:$0xff] %v13_v5  ;;  %v15_v9 = vadd.f32 %v180_v7, %v237_v1  ;;  %v24_v10 = vsel %vm244_vm2, %v240_v2, 128  ;;  %vm29_vm3 = vcmp.ge.s32.totalorder %v240_v2, 1  ;;  %s208_s2 = smov 2   ;;  %s215_s20 = smov 112  }
   0x5   :  { %25 = vrot.lane.b32.xlu0 %v22_v8, %s206_s12  ;;  %vm38_vm6 = vcmp.lt.s32.totalorder %v240_v2, 127  ;;  %vm47_vm9 = vcmp.ge.s32.totalorder %v240_v2, 2  ;;  %vm56_vm12 = vcmp.lt.s32.totalorder %v240_v2, 126  ;;  %vm65_vm15 = vcmp.ge.s32.totalorder %v240_v2, 4  ;;  %s216_s21 = smov 32   ;;  %s217_s22 = smov 96  }
   0x6   :  { %197 = vlog2.f32 %v15_v9  ;;  %s218_s23 = smov 64  }
   0x9   :  { %34 = vrot.lane.b32.xlu0 %v24_v10, %s207_s13 }
  0x10   :  { %v198_v11 = vpop.eup %197 }
  0x11   :  { %v17_v12 = vmul.f32 0.6931472, %v198_v11 }
  0x13   :  { %v262_v13 = vmul.f32 1.442695, %v17_v12 }
  0x15   :  { %v23_v14 = vsel %vm244_vm2, %v262_v13, 0.0 }
  0x16   :  { %27 = vrot.lane.b32.xlu1 %v23_v14, %s206_s12 }
  0x1a   :  { %36 = vrot.lane.b32.xlu1 %v23_v14, %s207_s13 }
  0x77   :  { %v26_v15 = vpop.permute.xlu0 %25 }
  0x78   :  { %vm30_vm4 = vcmp.gt.s32.totalorder %v26_v15, %v22_v8 }
  0x79   :  { %vm31_vm5 = vmand %vm29_vm3, %vm30_vm4  ;;  %vm74_vm3 = vcmp.lt.s32.totalorder %v240_v2, 124 }
  0x7a   :  { %v32_v16 = vsel %vm31_vm5, %v26_v15, %v22_v8 }
  0x7b   :  { %43 = vrot.lane.b32.xlu0 %v32_v16, %s208_s2  ;;  %v35_v17 = vpop.permute.xlu0 %34 }
  0x7c   :  { %vm39_vm7 = vcmp.lt.s32.totalorder %v35_v17, %v24_v10 }
  0x7d   :  { %vm40_vm8 = vmand %vm38_vm6, %vm39_vm7  ;;  %vm83_vm6 = vcmp.ge.s32.totalorder %v240_v2, 8 }
  0x7e   :  { %v41_v18 = vsel %vm40_vm8, %v35_v17, %v24_v10 }
  0x7f   :  { %52 = vrot.lane.b32.xlu1 %v41_v18, %s209_s14 }
  0x88   :  { %v28_v19 = vpop.permute.xlu1 %27 }
  0x89   :  { %v33_v20 = vsel %vm31_vm5, %v28_v19, %v23_v14 }
  0x8a   :  { %45 = vrot.lane.b32.xlu0 %v33_v20, %s208_s2 }
  0x8c   :  { %v37_v21 = vpop.permute.xlu1 %36 }
  0x8d   :  { %v42_v22 = vsel %vm40_vm8, %v37_v21, %v23_v14 }
  0x8e   :  { %54 = vrot.lane.b32.xlu1 %v42_v22, %s209_s14 }
  0xed   :  { %v44_v23 = vpop.permute.xlu0 %43 }
  0xee   :  { %vm48_vm10 = vcmp.gt.s32.totalorder %v44_v23, %v32_v16 }
  0xef   :  { %vm49_vm11 = vmand %vm47_vm9, %vm48_vm10  ;;  %vm92_vm9 = vcmp.lt.s32.totalorder %v240_v2, 120 }
  0xf0   :  { %v50_v24 = vsel %vm49_vm11, %v44_v23, %v32_v16 }
  0xf1   :  { %v53_v25 = vpop.permute.xlu1 %52  ;;  %61 = vrot.lane.b32.xlu0 %v50_v24, %s210_s15 }
  0xf2   :  { %vm57_vm13 = vcmp.lt.s32.totalorder %v53_v25, %v41_v18 }
  0xf3   :  { %vm58_vm14 = vmand %vm56_vm12, %vm57_vm13  ;;  %vm101_vm12 = vcmp.ge.s32.totalorder %v240_v2, 16 }
  0xf4   :  { %v59_v26 = vsel %vm58_vm14, %v53_v25, %v41_v18 }
  0xf5   :  { %70 = vrot.lane.b32.xlu1 %v59_v26, %s211_s16 }
  0xfc   :  { %v46_v27 = vpop.permute.xlu0 %45 }
  0xfd   :  { %v51_v28 = vsel %vm49_vm11, %v46_v27, %v33_v20 }
  0xfe   :  { %63 = vrot.lane.b32.xlu0 %v51_v28, %s210_s15 }
 0x100   :  { %v55_v29 = vpop.permute.xlu1 %54 }
 0x101   :  { %v60_v30 = vsel %vm58_vm14, %v55_v29, %v42_v22 }
 0x102   :  { %72 = vrot.lane.b32.xlu1 %v60_v30, %s211_s16 }
 0x163   :  { %v62_v31 = vpop.permute.xlu0 %61 }
 0x164   :  { %vm66_vm1 = vcmp.gt.s32.totalorder %v62_v31, %v50_v24 }
 0x165   :  { %vm67_vm2 = vmand %vm65_vm15, %vm66_vm1  ;;  %vm110_vm15 = vcmp.lt.s32.totalorder %v240_v2, 112 }
 0x166   :  { %v68_v32 = vsel %vm67_vm2, %v62_v31, %v50_v24 }
 0x167   :  { %v71_v33 = vpop.permute.xlu1 %70  ;;  %79 = vrot.lane.b32.xlu0 %v68_v32, %s212_s17 }
 0x168   :  { %vm75_vm4 = vcmp.lt.s32.totalorder %v71_v33, %v59_v26 }
 0x169   :  { %vm76_vm5 = vmand %vm74_vm3, %vm75_vm4  ;;  %vm119_vm3 = vcmp.ge.s32.totalorder %v240_v2, 32 }
 0x16a   :  { %v77_v34 = vsel %vm76_vm5, %v71_v33, %v59_v26 }
 0x16b   :  { %88 = vrot.lane.b32.xlu1 %v77_v34, %s213_s18 }
 0x170   :  { %v64_v35 = vpop.permute.xlu0 %63 }
 0x171   :  { %v69_v36 = vsel %vm67_vm2, %v64_v35, %v51_v28 }
 0x172   :  { %81 = vrot.lane.b32.xlu0 %v69_v36, %s212_s17 }
 0x174   :  { %v73_v37 = vpop.permute.xlu1 %72 }
 0x175   :  { %v78_v38 = vsel %vm76_vm5, %v73_v37, %v60_v30 }
 0x176   :  { %90 = vrot.lane.b32.xlu1 %v78_v38, %s213_s18 }
 0x1d9   :  { %v80_v39 = vpop.permute.xlu0 %79 }
 0x1da   :  { %vm84_vm7 = vcmp.gt.s32.totalorder %v80_v39, %v68_v32 }
 0x1db   :  { %vm85_vm8 = vmand %vm83_vm6, %vm84_vm7  ;;  %vm128_vm6 = vcmp.lt.s32.totalorder %v240_v2, 96 }
 0x1dc   :  { %v86_v40 = vsel %vm85_vm8, %v80_v39, %v68_v32 }
 0x1dd   :  { %v89_v41 = vpop.permute.xlu1 %88  ;;  %97 = vrot.lane.b32.xlu0 %v86_v40, %s214_s19 }
 0x1de   :  { %vm93_vm10 = vcmp.lt.s32.totalorder %v89_v41, %v77_v34 }
 0x1df   :  { %vm94_vm11 = vmand %vm92_vm9, %vm93_vm10  ;;  %vm137_vm9 = vcmp.ge.s32.totalorder %v240_v2, 64 }
 0x1e0   :  { %v95_v42 = vsel %vm94_vm11, %v89_v41, %v77_v34 }
 0x1e1   :  { %106 = vrot.lane.b32.xlu1 %v95_v42, %s215_s20 }
 0x1e4   :  { %v82_v43 = vpop.permute.xlu0 %81 }
 0x1e5   :  { %v87_v44 = vsel %vm85_vm8, %v82_v43, %v69_v36 }
 0x1e6   :  { %99 = vrot.lane.b32.xlu0 %v87_v44, %s214_s19 }
 0x1e8   :  { %v91_v45 = vpop.permute.xlu1 %90 }
 0x1e9   :  { %v96_v46 = vsel %vm94_vm11, %v91_v45, %v78_v38  ;;  %vm146_vm11 = vcmp.lt.s32.totalorder %v240_v2, 64 }
 0x1ea   :  { %108 = vrot.lane.b32.xlu1 %v96_v46, %s215_s20 }
 0x24f   :  { %v98_v47 = vpop.permute.xlu0 %97 }
 0x250   :  { %vm102_vm13 = vcmp.gt.s32.totalorder %v98_v47, %v86_v40 }
 0x251   :  { %vm103_vm14 = vmand %vm101_vm12, %vm102_vm13 }
 0x252   :  { %v104_v48 = vsel %vm103_vm14, %v98_v47, %v86_v40 }
 0x253   :  { %v107_v49 = vpop.permute.xlu1 %106  ;;  %115 = vrot.lane.b32.xlu0 %v104_v48, %s216_s21 }
 0x254   :  { %vm111_vm1 = vcmp.lt.s32.totalorder %v107_v49, %v95_v42 }
 0x255   :  { %vm112_vm2 = vmand %vm110_vm15, %vm111_vm1 }
 0x256   :  { %v113_v50 = vsel %vm112_vm2, %v107_v49, %v95_v42 }
 0x257   :  { %124 = vrot.lane.b32.xlu1 %v113_v50, %s217_s22 }
 0x258   :  { %v100_v51 = vpop.permute.xlu0 %99 }
 0x259   :  { %v105_v52 = vsel %vm103_vm14, %v100_v51, %v87_v44 }
 0x25a   :  { %117 = vrot.lane.b32.xlu0 %v105_v52, %s216_s21 }
 0x25c   :  { %v109_v53 = vpop.permute.xlu1 %108 }
 0x25d   :  { %v114_v54 = vsel %vm112_vm2, %v109_v53, %v96_v46 }
 0x25e   :  { %126 = vrot.lane.b32.xlu1 %v114_v54, %s217_s22 }
 0x2c5   :  { %v116_v55 = vpop.permute.xlu0 %115 }
 0x2c6   :  { %vm120_vm4 = vcmp.gt.s32.totalorder %v116_v55, %v104_v48 }
 0x2c7   :  { %vm121_vm5 = vmand %vm119_vm3, %vm120_vm4 }
 0x2c8   :  { %v122_v56 = vsel %vm121_vm5, %v116_v55, %v104_v48 }
 0x2c9   :  { %v125_v57 = vpop.permute.xlu1 %124  ;;  %133 = vrot.lane.b32.xlu0 %v122_v56, %s218_s23 }
 0x2ca   :  { %vm129_vm7 = vcmp.lt.s32.totalorder %v125_v57, %v113_v50 }
 0x2cb   :  { %vm130_vm8 = vmand %vm128_vm6, %vm129_vm7 }
 0x2cc   :  { %v118_v58 = vpop.permute.xlu0 %117  ;;  %v131_v59 = vsel %vm130_vm8, %v125_v57, %v113_v50 }
 0x2cd   :  { %142 = vrot.lane.b32.xlu1 %v131_v59, %s218_s23  ;;  %v123_v60 = vsel %vm121_vm5, %v118_v58, %v105_v52 }
 0x2ce   :  { %135 = vrot.lane.b32.xlu0 %v123_v60, %s218_s23 }
 0x2d0   :  { %v127_v61 = vpop.permute.xlu1 %126 }
 0x2d1   :  { %v132_v62 = vsel %vm130_vm8, %v127_v61, %v114_v54 }
 0x2d2   :  { %144 = vrot.lane.b32.xlu1 %v132_v62, %s218_s23 }
 0x33b   :  { %v134_v63 = vpop.permute.xlu0 %133 }
 0x33c   :  { %vm138_vm10 = vcmp.gt.s32.totalorder %v134_v63, %v122_v56 }
 0x33d   :  { %vm281_vm12 = vmand %vm137_vm9, %vm138_vm10 }
 0x33e   :  { %v140_v4 = vsel %vm281_vm12, %v134_v63, %v122_v56 }
 0x33f   :  { %v143_v3 = vpop.permute.xlu1 %142  ;;  %v157_v9 = vsub.s32 %v240_v2, %v140_v4  ;;  %vm151_vm2 = vcmp.ge.s32.totalorder %v140_v4, 0 }
 0x340   :  { %vm147_vm13 = vcmp.lt.s32.totalorder %v143_v3, %v131_v59  ;;  %v136_v11 = vpop.permute.xlu0 %135 }
 0x341   :  { %vm148_vm14 = vmand %vm146_vm11, %vm147_vm13  ;;  %v158_v14 = vcvt.s32.f32 %v157_v9  ;;  %v141_v16 = vsel %vm281_vm12, %v136_v11, %v123_v60 }
 0x342   :  { %v149_v5 = vsel %vm148_vm14, %v143_v3, %v131_v59  ;;  %v165_v20 = vsel %vm151_vm2, %v141_v16, -inf }
 0x343   :  { %v153_v6 = vsub.s32 %v149_v5, %v140_v4  ;;  %vm152_vm1 = vcmp.lt.s32.totalorder %v149_v5, 128 }
 0x344   :  { %v145_v10 = vpop.permute.xlu1 %144  ;;  %vm164_vm3 = vmand %vm151_vm2, %vm152_vm1 }
 0x345   :  { %vm154_vm15 = vcmp.gt.s32.totalorder %v153_v6, 1  ;;  %v150_v12 = vsel %vm148_vm14, %v145_v10, %v132_v62 }
 0x346   :  { %v155_v7 = vsel %vm154_vm15, %v153_v6, 1  ;;  %v161_v18 = vsub.f32 %v150_v12, %v141_v16  ;;  %v166_v22 = vsel %vm152_vm1, %v150_v12, %v165_v20 }
 0x347   :  { %v156_v8 = vcvt.s32.f32 %v155_v7 }
 0x349   :  { %199 = vrcp.f32 %v156_v8 }
 0x353   :  { %v200_v15 = vpop.eup %199 }
 0x354   :  { %v160_v17 = vmul.f32 %v200_v15, %v158_v14 }
 0x356   :  { %v162_v19 = vmul.f32 %v161_v18, %v160_v17 }
 0x358   :  { %v163_v21 = vadd.f32 %v162_v19, %v141_v16 }
 0x35a   :  { %v167_v23 = vsel %vm164_vm3, %v163_v21, %v166_v22 }
 0x35b   :  { %v168_v2 = vsel %vm11_vm0, %v167_v23, %v262_v13 }
 0x35c   :  { %201 = vpow2.f32 %v168_v2 }
 0x366   :  { %v202_v24 = vpop.eup %201 }
 0x367   :  { %170 = vst [vmem:[%s298_s1] sm:$0xff] %v202_v24 }

</bundles_post_ra>
